<compile_context>
chip_gen: v5e
topology: v5e:2x2
jax: 0.10.0
libtpu: 0.0.40
codegen_flags: <defaults>
</compile_context>

<pallas_src>
import math
import jax
import jax.numpy as jnp
from jax.experimental import pallas as pl
from jax.experimental.pallas import tpu as pltpu


def _round_up(x, m):
    return ((x + m - 1) // m) * m


def _pad2(a, target_shape):
    pads = [(0, t - s) for s, t in zip(a.shape, target_shape)]
    if all(p == (0, 0) for p in pads):
        return a
    return jnp.pad(a, pads)


def _vmem_capacity_bytes():
    try:
        return int(pltpu.get_tpu_info().vmem_capacity_bytes)
    except Exception:
        return 64 * 1024 * 1024  # conservative: v7x has 64 MiB per TensorCore


def _make_kernel(residual_mode):
    """residual_mode in ('x', 'explicit', 'none')."""

    def kernel(*refs):
        if residual_mode == "explicit":
            x_ref, wd_ref, bd_ref, wu_ref, bu_ref, res_ref, o_ref = refs
        else:
            x_ref, wd_ref, bd_ref, wu_ref, bu_ref, o_ref = refs

        x = x_ref[...]                                            # (TM, Cp), native dtype
        # down_proj (+bias) + ReLU ; f32 accumulation on the MXU
        down = jnp.dot(x, wd_ref[...], preferred_element_type=jnp.float32)
        down = jnp.maximum(down + bd_ref[...].astype(jnp.float32), 0.0)
        # dropout p=0.0 (inference) -> identity
        # up_proj (+bias); scale already folded into wu/bu by the wrapper
        up = jnp.dot(down.astype(wu_ref.dtype), wu_ref[...],
                     preferred_element_type=jnp.float32)
        up = up + bu_ref[...].astype(jnp.float32)
        if residual_mode == "x":
            up = up + x.astype(jnp.float32)                       # reuse resident x tile
        elif residual_mode == "explicit":
            up = up + res_ref[...].astype(jnp.float32)
        o_ref[...] = up.astype(o_ref.dtype)

    return kernel


def adapter_forward(x, w_down, b_down, w_up, b_up, *, scale=1.0,
                    add_residual=True, residual=None, tile_m=1024):
    """x: [B, N, C]; w_down: [C, D]; b_down: [D]; w_up: [D, O]; b_up: [O]."""
    B, N, C = x.shape
    D = w_down.shape[1]
    O = w_up.shape[1]

    if add_residual:
        if residual is None:
            assert O == C, "default residual=x requires out_channels == in_channels"
            residual_mode = "x"
        else:
            residual_mode = "explicit"
    else:
        residual_mode = "none"

    # Fold the adapter scale into the (tiny, reused) up-projection weights.
    # Safe for literal floats and traced/learnable scalars alike.
    if not (isinstance(scale, (int, float)) and float(scale) == 1.0):
        w_up = w_up * scale
        b_up = b_up * scale

    M = B * N
    lane = 128
    C_p = _round_up(C, lane)
    D_p = _round_up(D, lane)
    O_p = _round_up(O, lane)

    x_itemsize = jnp.dtype(x.dtype).itemsize
    w_itemsize = jnp.dtype(w_down.dtype).itemsize
    base = {4: 8, 2: 16, 1: 32}.get(x_itemsize, 8)        # sublane pack for activations

    # ---- VMEM-budget-driven row tile --------------------------------------
    cap = _vmem_capacity_bytes()                           # 128 MiB v5e/v6e, 64 MiB v7x
    usable = min(cap - (8 << 20), int(cap * 0.85))         # leave compiler headroom

    resident = (C_p * D_p + D_p + D_p * O_p + O_p) * w_itemsize   # weights, 1 buffer
    stream_row = C_p * x_itemsize + O_p * x_itemsize               # x tile + out tile
    if residual_mode == "explicit":
        stream_row += O_p * jnp.dtype(residual.dtype).itemsize
    compute_row = (D_p + O_p) * 4                          # f32 down/up intermediates
    per_row = 2 * stream_row + compute_row                 # streamed tiles double-buffered

    tile_budget = usable - 2 * resident - (2 << 20)
    tm_fit = base
    if tile_budget > per_row * base:
        tm_fit = (tile_budget // per_row) // base * base
    tm = max(base, min(_round_up(max(int(tile_m), base), base), tm_fit,
                       _round_up(M, base)))
    # Give megacore parts (v7x: 2 TCs) at least two grid steps when M allows.
    if M > base and pl.cdiv(M, tm) < 2:
        tm = max(base, _round_up(pl.cdiv(M, 2), base))

    needed = 2 * resident + tm * per_row + (2 << 20)
    vmem_limit = int(min(usable, max(needed + needed // 4, 16 << 20)))

    # ---- operands (channel padding only when not already lane-aligned) -----
    x2 = _pad2(x.reshape(M, C), (M, C_p))
    wd = _pad2(w_down, (C_p, D_p))
    bd = _pad2(b_down.reshape(1, D), (1, D_p))
    wu = _pad2(w_up, (D_p, O_p))
    bu = _pad2(b_up.reshape(1, O), (1, O_p))
    operands = [x2, wd, bd, wu, bu]
    if residual_mode == "explicit":
        operands.append(_pad2(residual.reshape(M, O), (M, O_p)))

    grid = (pl.cdiv(M, tm),)
    kernel = _make_kernel(residual_mode)

    def _call(single_buffer_weights):
        if single_buffer_weights:
            def wspec(shape):
                return pl.BlockSpec(shape, lambda i: (0, 0),
                                    pipeline_mode=pl.Buffered(1))
        else:
            def wspec(shape):
                return pl.BlockSpec(shape, lambda i: (0, 0))

        in_specs = [
            pl.BlockSpec((tm, C_p), lambda i: (i, 0)),     # x tile (streamed)
            wspec((C_p, D_p)),                             # down weight (resident)
            wspec((1, D_p)),                               # down bias
            wspec((D_p, O_p)),                             # up weight (resident)
            wspec((1, O_p)),                               # up bias
        ]
        if residual_mode == "explicit":
            in_specs.append(pl.BlockSpec((tm, O_p), lambda i: (i, 0)))

        return pl.pallas_call(
            kernel,
            out_shape=jax.ShapeDtypeStruct((M, O_p), x.dtype),
            grid_spec=pltpu.PrefetchScalarGridSpec(
                num_scalar_prefetch=0,
                grid=grid,
                in_specs=in_specs,
                out_specs=pl.BlockSpec((tm, O_p), lambda i: (i, 0)),
            ),
            compiler_params=pltpu.CompilerParams(
                dimension_semantics=("parallel",),
                vmem_limit_bytes=vmem_limit),
        )(*operands)

    try:
        out = _call(True)           # constant weight blocks single-buffered
    except Exception:
        out = _call(False)          # fallback: default double-buffering

    if O_p != O:
        out = out[:, :O]
    return out.reshape(B, N, O)


def adapter_reference(x, w_down, b_down, w_up, b_up, *, scale=1.0,
                      add_residual=True, residual=None):
    residual = x if residual is None else residual
    f32 = jnp.float32
    down = jnp.maximum(x.astype(f32) @ w_down.astype(f32) + b_down.astype(f32), 0.0)
    up = down @ w_up.astype(f32) + b_up.astype(f32)
    up = up * scale
    return up + residual.astype(f32) if add_residual else up


if __name__ == "__main__":
    # Small shapes consistent with the module: batch=2, seq=8, in_channels=32,
    # bottleneck=32 (module default), out_channels=in_channels.
    B, N, C, D = 2, 8, 32, 32
    O = C

    key = jax.random.PRNGKey(0)
    kx, kd, ku, kr = jax.random.split(key, 4)

    x = jax.random.normal(kx, (B, N, C), dtype=jnp.float32)

    # Deterministic kaiming-uniform-style init (a=sqrt(5)) for down_proj;
    # non-zero deterministic init for up_proj so the matmul path is exercised.
    bound_d = math.sqrt(6.0 / ((1.0 + 5.0) * C))
    w_down = jax.random.uniform(kd, (C, D), jnp.float32, -bound_d, bound_d)
    b_down = jnp.zeros((D,), jnp.float32)
    bound_u = math.sqrt(6.0 / ((1.0 + 5.0) * D))
    w_up = jax.random.uniform(ku, (D, O), jnp.float32, -bound_u, bound_u)
    b_up = jnp.zeros((O,), jnp.float32)

    # 1) default path: residual = x (reused in-kernel), scale='1.0'
    out = jax.block_until_ready(
        adapter_forward(x, w_down, b_down, w_up, b_up, scale=1.0, add_residual=True))
    ref = adapter_reference(x, w_down, b_down, w_up, b_up, scale=1.0, add_residual=True)
    assert out.shape == (B, N, O)
    assert jnp.allclose(out.astype(jnp.float32), ref, atol=1e-5, rtol=1e-5), \
        "mismatch vs reference (residual=x)"

    # 2) no residual (residual operand never passed / DMA'd)
    out_nr = jax.block_until_ready(
        adapter_forward(x, w_down, b_down, w_up, b_up, scale=1.0, add_residual=False))
    ref_nr = adapter_reference(x, w_down, b_down, w_up, b_up, scale=1.0,
                               add_residual=False)
    assert jnp.allclose(out_nr.astype(jnp.float32), ref_nr, atol=1e-5, rtol=1e-5), \
        "mismatch vs reference (no residual)"

    # 3) explicit residual + non-unit scale (folded into wu/bu) on a ragged M (N=7)
    x7 = x[:, :7, :]
    res7 = jax.random.normal(kr, (B, 7, O), dtype=jnp.float32)
    out_ex = jax.block_until_ready(
        adapter_forward(x7, w_down, b_down, w_up, b_up, scale=2.0,
                        add_residual=True, residual=res7))
    ref_ex = adapter_reference(x7, w_down, b_down, w_up, b_up, scale=2.0,
                               add_residual=True, residual=res7)
    assert jnp.allclose(out_ex.astype(jnp.float32), ref_ex, atol=1e-5, rtol=1e-5), \
        "mismatch vs reference (explicit residual / ragged M)"

    # 4) bf16 activations/weights (halved HBM traffic; f32 MXU accumulation)
    bf = jnp.bfloat16
    out_bf = jax.block_until_ready(
        adapter_forward(x.astype(bf), w_down.astype(bf), b_down.astype(bf),
                        w_up.astype(bf), b_up.astype(bf),
                        scale=1.0, add_residual=True))
    ref_bf = adapter_reference(x.astype(bf), w_down.astype(bf), b_down.astype(bf),
                               w_up.astype(bf), b_up.astype(bf),
                               scale=1.0, add_residual=True)
    assert out_bf.dtype == bf
    assert jnp.allclose(out_bf.astype(jnp.float32), ref_bf, atol=1e-1, rtol=1e-1), \
        "mismatch vs reference (bf16)"

    print("KERNEL_OK")
</pallas_src>

<mosaic_0001>
module attributes {stable_mosaic.version = 11 : i64} {
  func.func @kernel(%arg0: i32, %arg1: memref<8x128xf32, #tpu.memory_space<vmem>>, %arg2: memref<128x128xf32, #tpu.memory_space<vmem>>, %arg3: memref<1x128xf32, #tpu.memory_space<vmem>>, %arg4: memref<128x128xf32, #tpu.memory_space<vmem>>, %arg5: memref<1x128xf32, #tpu.memory_space<vmem>>, %arg6: memref<8x128xf32, #tpu.memory_space<vmem>>) attributes {dimension_semantics = [#tpu.dimension_semantics<parallel>], iteration_bounds = array<i64: 2>, scalar_prefetch = 0 : i64, scratch_operands = 0 : i64, tpu.core_type = #tpu.core_type<tc>, window_params = [{transform_indices = @transform_0, window_bounds = array<i64: 8, 128>}, {pipeline_mode = #tpu.pipeline_mode<synchronous>, transform_indices = @transform_1, window_bounds = array<i64: 128, 128>}, {pipeline_mode = #tpu.pipeline_mode<synchronous>, transform_indices = @transform_2, window_bounds = array<i64: 1, 128>}, {pipeline_mode = #tpu.pipeline_mode<synchronous>, transform_indices = @transform_3, window_bounds = array<i64: 128, 128>}, {pipeline_mode = #tpu.pipeline_mode<synchronous>, transform_indices = @transform_4, window_bounds = array<i64: 1, 128>}, {transform_indices = @transform_5, window_bounds = array<i64: 8, 128>}]} {
    %c0 = arith.constant 0 : index
    %c0_0 = arith.constant 0 : index
    %0 = vector.load %arg1[%c0, %c0_0] : memref<8x128xf32, #tpu.memory_space<vmem>>, vector<8x128xf32>
    %c0_1 = arith.constant 0 : index
    %c0_2 = arith.constant 0 : index
    %1 = vector.load %arg2[%c0_1, %c0_2] : memref<128x128xf32, #tpu.memory_space<vmem>>, vector<128x128xf32>
    %cst = arith.constant dense<0.000000e+00> : vector<8x128xf32>
    %2 = tpu.matmul %0, %1, %cst {dimension_numbers = #tpu.dot_dimension_numbers<[1], [0], [0], [1], [0, 0, 1, 1], [], []>} : vector<8x128xf32>, vector<128x128xf32>, vector<8x128xf32> -> vector<8x128xf32>
    %c0_3 = arith.constant 0 : index
    %c0_4 = arith.constant 0 : index
    %3 = vector.load %arg3[%c0_3, %c0_4] : memref<1x128xf32, #tpu.memory_space<vmem>>, vector<1x128xf32>
    %4 = vector.broadcast %3 : vector<1x128xf32> to vector<8x128xf32>
    %5 = arith.addf %2, %4 : vector<8x128xf32>
    %cst_5 = arith.constant 0.000000e+00 : f32
    %6 = vector.broadcast %cst_5 : f32 to vector<8x128xf32>
    %7 = arith.maximumf %5, %6 : vector<8x128xf32>
    %c0_6 = arith.constant 0 : index
    %c0_7 = arith.constant 0 : index
    %8 = vector.load %arg4[%c0_6, %c0_7] : memref<128x128xf32, #tpu.memory_space<vmem>>, vector<128x128xf32>
    %cst_8 = arith.constant dense<0.000000e+00> : vector<8x128xf32>
    %9 = tpu.matmul %7, %8, %cst_8 {dimension_numbers = #tpu.dot_dimension_numbers<[1], [0], [0], [1], [0, 0, 1, 1], [], []>} : vector<8x128xf32>, vector<128x128xf32>, vector<8x128xf32> -> vector<8x128xf32>
    %c0_9 = arith.constant 0 : index
    %c0_10 = arith.constant 0 : index
    %10 = vector.load %arg5[%c0_9, %c0_10] : memref<1x128xf32, #tpu.memory_space<vmem>>, vector<1x128xf32>
    %11 = vector.broadcast %10 : vector<1x128xf32> to vector<8x128xf32>
    %12 = arith.addf %9, %11 : vector<8x128xf32>
    %13 = arith.addf %12, %0 : vector<8x128xf32>
    %c0_11 = arith.constant 0 : index
    %c0_12 = arith.constant 0 : index
    %14 = vector.load %arg6[%c0_11, %c0_12] : memref<8x128xf32, #tpu.memory_space<vmem>>, vector<8x128xf32>
    tpu.vector_store %arg6[%c0_11, %c0_12], %13 {strides = array<i32>} : memref<8x128xf32, #tpu.memory_space<vmem>>, vector<8x128xf32>,
    return
  }
  func.func @transform_0(%arg0: i32) -> (i32, i32) {
    %c0_i32 = arith.constant 0 : i32
    %c0_i32_0 = arith.constant 0 : i32
    return %arg0, %c0_i32 : i32, i32
  }
  func.func @transform_1(%arg0: i32) -> (i32, i32) {
    %c0_i32 = arith.constant 0 : i32
    %c0_i32_0 = arith.constant 0 : i32
    %c0_i32_1 = arith.constant 0 : i32
    return %c0_i32, %c0_i32_0 : i32, i32
  }
  func.func @transform_2(%arg0: i32) -> (i32, i32) {
    %c0_i32 = arith.constant 0 : i32
    %c0_i32_0 = arith.constant 0 : i32
    %c0_i32_1 = arith.constant 0 : i32
    return %c0_i32, %c0_i32_0 : i32, i32
  }
  func.func @transform_3(%arg0: i32) -> (i32, i32) {
    %c0_i32 = arith.constant 0 : i32
    %c0_i32_0 = arith.constant 0 : i32
    %c0_i32_1 = arith.constant 0 : i32
    return %c0_i32, %c0_i32_0 : i32, i32
  }
  func.func @transform_4(%arg0: i32) -> (i32, i32) {
    %c0_i32 = arith.constant 0 : i32
    %c0_i32_0 = arith.constant 0 : i32
    %c0_i32_1 = arith.constant 0 : i32
    return %c0_i32, %c0_i32_0 : i32, i32
  }
  func.func @transform_5(%arg0: i32) -> (i32, i32) {
    %c0_i32 = arith.constant 0 : i32
    %c0_i32_0 = arith.constant 0 : i32
    return %arg0, %c0_i32 : i32, i32
  }
}

module attributes {stable_mosaic.version = 11 : i64} {
  func.func @kernel(%arg0: i32, %arg1: memref<8x128xf32, #tpu.memory_space<vmem>>, %arg2: memref<128x128xf32, #tpu.memory_space<vmem>>, %arg3: memref<1x128xf32, #tpu.memory_space<vmem>>, %arg4: memref<128x128xf32, #tpu.memory_space<vmem>>, %arg5: memref<1x128xf32, #tpu.memory_space<vmem>>, %arg6: memref<8x128xf32, #tpu.memory_space<vmem>>) attributes {dimension_semantics = [#tpu.dimension_semantics<parallel>], iteration_bounds = array<i64: 2>, scalar_prefetch = 0 : i64, scratch_operands = 0 : i64, tpu.core_type = #tpu.core_type<tc>, window_params = [{transform_indices = @transform_0, window_bounds = array<i64: 8, 128>}, {pipeline_mode = #tpu.pipeline_mode<synchronous>, transform_indices = @transform_1, window_bounds = array<i64: 128, 128>}, {pipeline_mode = #tpu.pipeline_mode<synchronous>, transform_indices = @transform_2, window_bounds = array<i64: 1, 128>}, {pipeline_mode = #tpu.pipeline_mode<synchronous>, transform_indices = @transform_3, window_bounds = array<i64: 128, 128>}, {pipeline_mode = #tpu.pipeline_mode<synchronous>, transform_indices = @transform_4, window_bounds = array<i64: 1, 128>}, {transform_indices = @transform_5, window_bounds = array<i64: 8, 128>}]} {
    %c0 = arith.constant 0 : index
    %c0_0 = arith.constant 0 : index
    %0 = vector.load %arg1[%c0, %c0_0] : memref<8x128xf32, #tpu.memory_space<vmem>>, vector<8x128xf32>
    %c0_1 = arith.constant 0 : index
    %c0_2 = arith.constant 0 : index
    %1 = vector.load %arg2[%c0_1, %c0_2] : memref<128x128xf32, #tpu.memory_space<vmem>>, vector<128x128xf32>
    %cst = arith.constant dense<0.000000e+00> : vector<8x128xf32>
    %2 = tpu.matmul %0, %1, %cst {dimension_numbers = #tpu.dot_dimension_numbers<[1], [0], [0], [1], [0, 0, 1, 1], [], []>} : vector<8x128xf32>, vector<128x128xf32>, vector<8x128xf32> -> vector<8x128xf32>
    %c0_3 = arith.constant 0 : index
    %c0_4 = arith.constant 0 : index
    %3 = vector.load %arg3[%c0_3, %c0_4] : memref<1x128xf32, #tpu.memory_space<vmem>>, vector<1x128xf32>
    %4 = vector.broadcast %3 : vector<1x128xf32> to vector<8x128xf32>
    %5 = arith.addf %2, %4 : vector<8x128xf32>
    %cst_5 = arith.constant 0.000000e+00 : f32
    %6 = vector.broadcast %cst_5 : f32 to vector<8x128xf32>
    %7 = arith.maximumf %5, %6 : vector<8x128xf32>
    %c0_6 = arith.constant 0 : index
    %c0_7 = arith.constant 0 : index
    %8 = vector.load %arg4[%c0_6, %c0_7] : memref<128x128xf32, #tpu.memory_space<vmem>>, vector<128x128xf32>
    %cst_8 = arith.constant dense<0.000000e+00> : vector<8x128xf32>
    %9 = tpu.matmul %7, %8, %cst_8 {dimension_numbers = #tpu.dot_dimension_numbers<[1], [0], [0], [1], [0, 0, 1, 1], [], []>} : vector<8x128xf32>, vector<128x128xf32>, vector<8x128xf32> -> vector<8x128xf32>
    %c0_9 = arith.constant 0 : index
    %c0_10 = arith.constant 0 : index
    %10 = vector.load %arg5[%c0_9, %c0_10] : memref<1x128xf32, #tpu.memory_space<vmem>>, vector<1x128xf32>
    %11 = vector.broadcast %10 : vector<1x128xf32> to vector<8x128xf32>
    %12 = arith.addf %9, %11 : vector<8x128xf32>
    %13 = arith.addf %12, %0 : vector<8x128xf32>
    %c0_11 = arith.constant 0 : index
    %c0_12 = arith.constant 0 : index
    %14 = vector.load %arg6[%c0_11, %c0_12] : memref<8x128xf32, #tpu.memory_space<vmem>>, vector<8x128xf32>
    tpu.vector_store %arg6[%c0_11, %c0_12], %13 {strides = array<i32>} : memref<8x128xf32, #tpu.memory_space<vmem>>, vector<8x128xf32>,
    return
  }
  func.func @transform_0(%arg0: i32) -> (i32, i32) {
    %c0_i32 = arith.constant 0 : i32
    %c0_i32_0 = arith.constant 0 : i32
    return %arg0, %c0_i32 : i32, i32
  }
  func.func @transform_1(%arg0: i32) -> (i32, i32) {
    %c0_i32 = arith.constant 0 : i32
    %c0_i32_0 = arith.constant 0 : i32
    %c0_i32_1 = arith.constant 0 : i32
    return %c0_i32, %c0_i32_0 : i32, i32
  }
  func.func @transform_2(%arg0: i32) -> (i32, i32) {
    %c0_i32 = arith.constant 0 : i32
    %c0_i32_0 = arith.constant 0 : i32
    %c0_i32_1 = arith.constant 0 : i32
    return %c0_i32, %c0_i32_0 : i32, i32
  }
  func.func @transform_3(%arg0: i32) -> (i32, i32) {
    %c0_i32 = arith.constant 0 : i32
    %c0_i32_0 = arith.constant 0 : i32
    %c0_i32_1 = arith.constant 0 : i32
    return %c0_i32, %c0_i32_0 : i32, i32
  }
  func.func @transform_4(%arg0: i32) -> (i32, i32) {
    %c0_i32 = arith.constant 0 : i32
    %c0_i32_0 = arith.constant 0 : i32
    %c0_i32_1 = arith.constant 0 : i32
    return %c0_i32, %c0_i32_0 : i32, i32
  }
  func.func @transform_5(%arg0: i32) -> (i32, i32) {
    %c0_i32 = arith.constant 0 : i32
    %c0_i32_0 = arith.constant 0 : i32
    return %arg0, %c0_i32 : i32, i32
  }
}

</mosaic_0001>

<bundles_post_ra>
// kernel: tpu_custom_call.1
= control target key start
LH: loop header
LB: loop body
LE: loop exit
PB: predicated region body
PF: predicated region fallthrough
CT: control target
= control target key end

     0   :  { %10 = vsyncpa [#allocation3], 0  ;;  %s905_s0 = inlined_call_operand.hbm [shape: f32[16,128], index: 0, kind: input, shape index: {}]   ;;  %s906_s1 = inlined_call_operand.hbm [shape: f32[128,128], index: 1, kind: input, shape index: {}]   ;;  %s907_s2 = inlined_call_operand.vmem [shape: f32[1,128], index: 2, kind: input, shape index: {}]   ;;  %s908_s3 = inlined_call_operand.hbm [shape: f32[128,128], index: 3, kind: input, shape index: {}]   ;;  %s909_s4 = inlined_call_operand.vmem [shape: f32[1,128], index: 4, kind: input, shape index: {}]   ;;  %s910_s5 = inlined_call_operand.hbm [shape: f32[16,128], index: 5, kind: output, shape index: {}]  }
   0x1   :  { %12 = vsyncpa [#allocation3 + $0x1], 0 }
   0x2   :  { %13 = vsyncpa [#allocation6], 0 }
   0x3   :  { %14 = vsyncpa [#allocation4], 0 }
   0x4   :  { %16 = vsyncpa [#allocation4 + $0x1], 0  ;;  %s747_s18 = smov 0   ;;  %s749_s19 = smov 0  }
   0x5   :  { %s751_s20 = smov 0   ;;  %s753_s21 = smov 0  }
   0x6 LB: > { %s174_s24 = sshll.u32 %s906_s1, 4  ;;  %s771_s25 = sadd.s32 4294967295, %s711_s21   ;;  %s711_s21 = sphi %s753_s21, %s921_s21   ;;  %s707_s20 = sphi %s751_s20, %s920_s20   ;;  %s703_s19 = sphi %s749_s19, %s919_s19   ;;  %s699_s18 = sphi %s747_s18, %s918_s18   ;;  %s175_s24 = int_to_ptr.hbm [resolvable:$true] %s174_s24 }
   0x7   : > { %p465_p0 = scmp.ge.s32.totalorder %s711_s21, 1  ;;  %p43_p1 = scmp.eq.s32.totalorder %s771_s25, 0 }
   0x8   : > { %p163_p2 = scmp.lt.s32.totalorder %s711_s21, 3  ;;  %s713_s27 = smov [#allocation5]  }
   0x9   : > { %s176_s28 = sshll.u32 %s713_s27, 4  ;;  %s191_s6 = sshll.u32 %s908_s3, 4  ;;  %s177_s28 = int_to_ptr.vmem [resolvable:$true] %s176_s28  ;;  %s192_s6 = int_to_ptr.hbm [resolvable:$true] %s191_s6 }
   0xa   : > { %p776_p3 = pnand %p465_p0, %p163_p2  ;;  %s714_s7 = smov [#allocation7]  }
   0xb   : > { %s193_s8 = sshll.u32 %s714_s7, 4  ;;  %s715_s9 = smov 128   ;;  %s194_s8 = int_to_ptr.vmem [resolvable:$true] %s193_s8 }
   0xc   : > { %p492_p4 = pneg %p776_p3  ;;  %s716_s10 = smov 8  }
   0xd   : > { %s464_s11 = sadd.s32 4294967294, %s711_s21   ;;  %s790_s12 = sadd.s32 1, %s711_s21  }
   0xe   : > { %p493_p6 = pnand %p492_p4, %p43_p1  ;;  %s26_s13 = ssub.s32 %s711_s21, %s790_s12 }
   0xf   : > { %s29_s14 = sadd.s32 1, %s707_s20  ;;  %p27_p7 = scmp.eq.s32.totalorder %s26_s13, 0 }
  0x10   : > { %495 = dma.hbm_to_vmem [thread:$0]  (!%p493_p6), %s175_s24, 2048, %s177_s28, [#allocation6], %s715_s9, %s715_s9, %s716_s10  }
  0x11   : > { %498 = dma.hbm_to_vmem [thread:$0]  (!%p493_p6), %s192_s6, 2048, %s194_s8, [#allocation6], %s715_s9, %s715_s9, %s716_s10  }
  0x12   : > { %p36_p8 = scmp.ne.s32.totalorder %s707_s20, %s703_s19  ;;  %p37_p9 = scmp.eq.s32.totalorder %s711_s21, 0 }
  0x13   : > { %p42_p10 = scmp.ne.s32.totalorder %s703_s19, %s699_s18  ;;  %p150_p13 = scmp.eq.s32.totalorder %s771_s25, 1 }
  0x14   : > { %s801_s15 = scalar_select %p27_p7, %s707_s20, %s29_s14  }
  0x15   : > { %p803_p11 = por %p37_p9, %p36_p8  ;;  %p809_p12 = por %p43_p1, %p42_p10 }
  0x16   : > { %p156_p0 = scmp.eq.s32.totalorder %s464_s11, 1  ;;  %p509_p2 = scmp.lt.s32.totalorder %s711_s21, 2 }
  0x17   : > { %s210_s22 = sand.u32 1, %s707_s20   ;;  %p816_p4 = por %p150_p13, %p36_p8 }
  0x18   : > { %p820_p6 = por %p156_p0, %p42_p10  ;;  %s469_s27 = sshll.u32 %s210_s22, 3 }
  0x19   : > { %s470_s28 = sshll.u32 %s711_s21, 3  ;;  %s214_s7 = scalar_lea.vmem [#allocation2], %s469_s27 }
  0x1a   : > { %s218_s6 = scalar_lea.hbm %s905_s0, %s470_s28  ;;  %s222_s8 = sshll.u32 %s214_s7, 4  ;;  %s223_s8 = int_to_ptr.vmem [resolvable:$true] %s222_s8 }
  0x1b   : > { %s220_s9 = sshll.u32 %s218_s6, 4  ;;  %p830_p7 = pnand %p509_p2, %p803_p11  ;;  %s221_s9 = int_to_ptr.hbm [resolvable:$true] %s220_s9 }
  0x1c   : > { %s211_s11 = scalar_lea.sflag [#allocation3], %s210_s22  ;;  %s611_s13 = sshra.s32 %s221_s9, 4  ;;  %s612_s13 = int_to_ptr.hbm [resolvable:$true] %s611_s13 }
  0x1d   : > { %s613_s14 = scalar_lea.hbm %s612_s13, 8  ;;  %p615_p9 = pneg %p830_p7 }
  0x1e   : > { %p614_p8 = scmp.ne.s32.totalorder %s612_s13, %s613_s14  ;;  %s618_s29 = scalar_lea.hbm %s905_s0, 16 }
  0x1f   : > { %p619_p11 = scmp.lt.s32.totalorder %s612_s13, %s905_s0  ;;  %p620_p0 = scmp.lt.s32.totalorder %s618_s29, %s613_s14 }
  0x20   : > { %p616_p10 = pnand %p615_p9, %p614_p8 }
  0x21   : > { %p621_p2 = por %p620_p0, %p619_p11 }
  0x22   : > { %p617_p13 = pneg %p616_p10 }
  0x24   : > { %p622_p5 = pnand %p621_p2, %p617_p13 }
  0x26   : > { %625 = shalt.err (!%p622_p5)
}
  0x27   : > { %502 = dma.hbm_to_vmem [thread:$0]  (!%p830_p7), %s221_s9, 128, %s223_s8, %s211_s11  }
  0x28   : > { %231 = sbr.rel (%p776_p3) target bundleno = 343 (0x157), region = 40  ;;  %s847_s22 = sand.u32 (!%p776_p3), 1, %s703_s19  }
  0x29   : > { %s472_s6 = sshll.u32 (!%p776_p3), %s847_s22, 3  ;;  %s234_s7 = scalar_lea.sflag (!%p776_p3), [#allocation3], %s847_s22 }
  0x2a   : > { %s853_s13 = scalar_lea.vmem (!%p776_p3), [#allocation2], %s472_s6 }
  0x2d   : > { %686 = dma.done.wait (%p809_p12), %s234_s7, 128  }
  0x2e   : > { %688 = vsyncadd (%p809_p12), %s234_s7, 4294967168 }
  0x2f   : > { %690 = dma.done.wait (%p43_p1), [#allocation6], 4096  }
  0x30   : > { %692 = vsyncadd (%p43_p1), [#allocation6], 4294963200  ;;  %v291_v0 = vld [vmem:[#allocation5 + $0x78] sm:$0xff]  ;;  %v290_v1 = vld [vmem:[#allocation5 + $0x70] sm:$0xff]  ;;  %s477_s8 = sshll.u32 %s771_s25, 3  ;;  %s274_s28 = scalar_lea.vmem [#allocation8], %s472_s6 }
  0x31   : > { %296 = vmatpush.msra.mxu0 %v291_v0  ;;  %v289_v2 = vld [vmem:[#allocation5 + $0x68] sm:$0xff]  ;;  %v288_v3 = vld [vmem:[#allocation5 + $0x60] sm:$0xff]  ;;  %v332_v4 = vld [vmem:[#allocation7 + $0x78] sm:$0xff]  ;;  %s370_s27 = scalar_lea.hbm %s910_s5, %s477_s8  ;;  %s372_s29 = sshll.u32 %s274_s28, 4  ;;  %s373_s29 = int_to_ptr.vmem [resolvable:$true] %s372_s29 }
  0x32   : > { %v287_v5 = vld [vmem:[#allocation5 + $0x58] sm:$0xff]  ;;  %337 = vmatpush.msra.mxu1 %v332_v4  ;;  %v331_v6 = vld [vmem:[#allocation7 + $0x70] sm:$0xff]  ;;  %v330_v7 = vld [vmem:[#allocation7 + $0x68] sm:$0xff]  ;;  %s374_s30 = sshll.u32 %s370_s27, 4  ;;  %s360_s25 = scalar_lea.sflag [#allocation4], %s847_s22  ;;  %s375_s30 = int_to_ptr.hbm [resolvable:$true] %s374_s30 }
  0x33   : > { %297 = vmatpush.msra.mxu0 %v290_v1  ;;  %v286_v8 = vld [vmem:[#allocation5 + $0x50] sm:$0xff]  ;;  %v329_v9 = vld [vmem:[#allocation7 + $0x60] sm:$0xff]  ;;  %v285_v10 = vld [vmem:[#allocation5 + $0x48] sm:$0xff]  ;;  %s655_s16 = sshra.s32 %s375_s30, 4  ;;  %s661_s17 = scalar_lea.hbm %s910_s5, 16  ;;  %s656_s16 = int_to_ptr.hbm [resolvable:$true] %s655_s16 }
  0x34   : > { %338 = vmatpush.msra.mxu1 %v331_v6  ;;  %v328_v11 = vld [vmem:[#allocation7 + $0x58] sm:$0xff]  ;;  %v284_v12 = vld [vmem:[#allocation5 + $0x40] sm:$0xff]  ;;  %v327_v13 = vld [vmem:[#allocation7 + $0x50] sm:$0xff]  ;;  %s657_s7 = scalar_lea.hbm %s656_s16, 8  ;;  %p662_p12 = scmp.lt.s32.totalorder %s656_s16, %s910_s5 }
  0x35   : > { %298 = vmatpush.msra.mxu0 %v289_v2  ;;  %v283_v14 = vld [vmem:[#allocation5 + $0x38] sm:$0xff]  ;;  %v326_v15 = vld [vmem:[#allocation7 + $0x48] sm:$0xff]  ;;  %v282_v16 = vld [vmem:[#allocation5 + $0x30] sm:$0xff]  ;;  %p658_p1 = scmp.ne.s32.totalorder %s656_s16, %s657_s7  ;;  %p663_p7 = scmp.lt.s32.totalorder %s661_s17, %s657_s7 }
  0x36   : > { %339 = vmatpush.msra.mxu1 %v330_v7  ;;  %v325_v17 = vld [vmem:[#allocation7 + $0x40] sm:$0xff]  ;;  %v281_v18 = vld [vmem:[#allocation5 + $0x28] sm:$0xff]  ;;  %v324_v19 = vld [vmem:[#allocation7 + $0x38] sm:$0xff] }
  0x37   : > { %299 = vmatpush.msra.mxu0 %v288_v3  ;;  %v280_v20 = vld [vmem:[#allocation5 + $0x20] sm:$0xff]  ;;  %v323_v21 = vld [vmem:[#allocation7 + $0x30] sm:$0xff]  ;;  %v279_v22 = vld [vmem:[#allocation5 + $0x18] sm:$0xff]  ;;  %p659_p3 = pnand %p658_p1, %p816_p4  ;;  %p664_p8 = por %p663_p7, %p662_p12 }
  0x38   : > { %340 = vmatpush.msra.mxu1 %v329_v9  ;;  %v322_v23 = vld [vmem:[#allocation7 + $0x28] sm:$0xff]  ;;  %v278_v24 = vld [vmem:[#allocation5 + $0x10] sm:$0xff]  ;;  %v321_v25 = vld [vmem:[#allocation7 + $0x20] sm:$0xff] }
  0x39   : > { %300 = vmatpush.msra.mxu0 %v287_v5  ;;  %v277_v26 = vld [vmem:[#allocation5 + $0x8] sm:$0xff]  ;;  %v320_v27 = vld [vmem:[#allocation7 + $0x18] sm:$0xff]  ;;  %v276_v28 = vld [vmem:[#allocation5] sm:$0xff]  ;;  %p660_p5 = pneg %p659_p3 }
  0x3a   : > { %341 = vmatpush.msra.mxu1 %v328_v11  ;;  %v275_v29 = vld [vmem:[%s853_s13] sm:$0xff]  ;;  %v318_v31 = vld [vmem:[#allocation7 + $0x8] sm:$0xff]  ;;  %v317_v32 = vld [vmem:[#allocation7] sm:$0xff] }
  0x3b   : > { %301 = vmatpush.msra.mxu0 %v286_v8  ;;  %v319_v30 = vld [vmem:[#allocation7 + $0x10] sm:$0xff]  ;;  %p665_p9 = pnand %p664_p8, %p660_p5 }
  0x3c   : > { %342 = vmatpush.msra.mxu1 %v327_v13  ;;  %v549_v33 = vld [vmem:[%s907_s2] ss:$0 sm:$0xff] }
  0x3d   : > { %302 = vmatpush.msra.mxu0 %v285_v10  ;;  %v550_v37 = vld [vmem:[%s909_s4] ss:$0 sm:$0xff] }
  0x3e   : > { %343 = vmatpush.msra.mxu1 %v326_v15 }
  0x3f   : > { %303 = vmatpush.msra.mxu0 %v284_v12 }
  0x40   : > { %344 = vmatpush.msra.mxu1 %v325_v17 }
  0x41   : > { %304 = vmatpush.msra.mxu0 %v283_v14 }
  0x42   : > { %345 = vmatpush.msra.mxu1 %v324_v19 }
  0x43   : > { %305 = vmatpush.msra.mxu0 %v282_v16 }
  0x44   : > { %346 = vmatpush.msra.mxu1 %v323_v21 }
  0x45   : > { %306 = vmatpush.msra.mxu0 %v281_v18 }
  0x46   : > { %347 = vmatpush.msra.mxu1 %v322_v23 }
  0x47   : > { %307 = vmatpush.msra.mxu0 %v280_v20 }
  0x48   : > { %348 = vmatpush.msra.mxu1 %v321_v25 }
  0x49   : > { %308 = vmatpush.msra.mxu0 %v279_v22 }
  0x4a   : > { %349 = vmatpush.msra.mxu1 %v320_v27 }
  0x4b   : > { %309 = vmatpush.msra.mxu0 %v278_v24 }
  0x4c   : > { %350 = vmatpush.msra.mxu1 %v319_v30 }
  0x4d   : > { %310 = vmatpush.msra.mxu0 %v277_v26 }
  0x4e   : > { %351 = vmatpush.msra.mxu1 %v318_v31 }
  0x4f   : > { %311 = vmatpush.msra.mxu0 %v276_v28 }
  0x50   : > { %312 = vmatmul.f32.vlgmr.msra.gmra.mxu0 %v275_v29  ;;  %352 = vmatpush.msra.mxu1 %v317_v32 }
  0xcd   : > { %v313_v34 = vpop.f32.mrf.mxu0 }
  0xce   : > { %v314_v35 = vadd.f32 %v549_v33, %v313_v34 }
  0xd0   : > { %v316_v36 = vmax.f32 %v314_v35, 0.0 }
  0xd2   : > { %353 = vmatmul.f32.vlgmr.msra.gmra.mxu1 %v316_v36 }
 0x14f   : > { %v354_v38 = vpop.f32.mrf.mxu1 }
 0x150   : > { %v355_v39 = vadd.f32 %v550_v37, %v354_v38 }
 0x152   : > { %v357_v40 = vadd.f32 %v355_v39, %v275_v29 }
 0x154   : > { %358 = vst [vmem:[%s274_s28] sm:$0xff] %v357_v40 }
 0x155   : > { %668 = shalt.err (!%p665_p9)
}
 0x156   : > { %490 = dma.vmem_to_hbm [thread:$0]  (%p816_p4), %s373_s29, 128, %s375_s30, %s360_s25  }
 0x157 PF: > { %s386_s22 = sand.u32 1, %s699_s18   ;;  %p917_p10 = scmp.ge.s32.totalorder %s711_s21, 2 }
 0x158   : > { %s387_s9 = scalar_lea.sflag [#allocation4], %s386_s22 }
 0x159   : > { %p504_p13 = pnand %p917_p10, %p820_p6 }
 0x15b   : > { %p505_p11 = pneg %p504_p13 }
 0x15d   : > { %694 = dma.done.wait (%p505_p11), %s387_s9, 128  }
 0x15e   : > { %696 = vsyncadd (%p505_p11), %s387_s9, 4294967168  ;;  %p19_p0 = scmp.ge.s32.totalorder %s790_s12, 4   ;;  %s918_s18 = smov %s703_s19 }
 0x15f   : > { %s919_s19 = smov %s707_s20  ;;  %s920_s20 = smov %s801_s15 }
 0x160   : > { %s921_s21 = smov %s790_s12  ;;  %21 = sbr.rel (!%p19_p0) target bundleno = 6 (0x6), region = 93 }
 0x165   :  { %393 = vsyncpa [#allocation3], 1 }
 0x166   :  { %395 = vsyncpa [#allocation3 + $0x1], 1 }
 0x167   :  { %396 = vsyncpa [#allocation6], 1 }
 0x168   :  { %397 = vsyncpa [#allocation4], 1 }
 0x169   :  { %399 = vsyncpa [#allocation4 + $0x1], 1 }

// kernel: tpu_custom_call.1
= control target key start
LH: loop header
LB: loop body
LE: loop exit
PB: predicated region body
PF: predicated region fallthrough
CT: control target
= control target key end

     0   :  { %10 = vsyncpa [#allocation3], 0  ;;  %s905_s0 = inlined_call_operand.hbm [shape: f32[16,128], index: 0, kind: input, shape index: {}]   ;;  %s906_s1 = inlined_call_operand.hbm [shape: f32[128,128], index: 1, kind: input, shape index: {}]   ;;  %s907_s2 = inlined_call_operand.vmem [shape: f32[1,128], index: 2, kind: input, shape index: {}]   ;;  %s908_s3 = inlined_call_operand.hbm [shape: f32[128,128], index: 3, kind: input, shape index: {}]   ;;  %s909_s4 = inlined_call_operand.vmem [shape: f32[1,128], index: 4, kind: input, shape index: {}]   ;;  %s910_s5 = inlined_call_operand.hbm [shape: f32[16,128], index: 5, kind: output, shape index: {}]  }
   0x1   :  { %12 = vsyncpa [#allocation3 + $0x1], 0 }
   0x2   :  { %13 = vsyncpa [#allocation6], 0 }
   0x3   :  { %14 = vsyncpa [#allocation4], 0 }
   0x4   :  { %16 = vsyncpa [#allocation4 + $0x1], 0  ;;  %s747_s18 = smov 0   ;;  %s749_s19 = smov 0  }
   0x5   :  { %s751_s20 = smov 0   ;;  %s753_s21 = smov 0  }
   0x6 LB: > { %s174_s24 = sshll.u32 %s906_s1, 4  ;;  %s771_s25 = sadd.s32 4294967295, %s711_s21   ;;  %s711_s21 = sphi %s753_s21, %s921_s21   ;;  %s707_s20 = sphi %s751_s20, %s920_s20   ;;  %s703_s19 = sphi %s749_s19, %s919_s19   ;;  %s699_s18 = sphi %s747_s18, %s918_s18   ;;  %s175_s24 = int_to_ptr.hbm [resolvable:$true] %s174_s24 }
   0x7   : > { %p465_p0 = scmp.ge.s32.totalorder %s711_s21, 1  ;;  %p43_p1 = scmp.eq.s32.totalorder %s771_s25, 0 }
   0x8   : > { %p163_p2 = scmp.lt.s32.totalorder %s711_s21, 3  ;;  %s713_s27 = smov [#allocation5]  }
   0x9   : > { %s176_s28 = sshll.u32 %s713_s27, 4  ;;  %s191_s6 = sshll.u32 %s908_s3, 4  ;;  %s177_s28 = int_to_ptr.vmem [resolvable:$true] %s176_s28  ;;  %s192_s6 = int_to_ptr.hbm [resolvable:$true] %s191_s6 }
   0xa   : > { %p776_p3 = pnand %p465_p0, %p163_p2  ;;  %s714_s7 = smov [#allocation7]  }
   0xb   : > { %s193_s8 = sshll.u32 %s714_s7, 4  ;;  %s715_s9 = smov 128   ;;  %s194_s8 = int_to_ptr.vmem [resolvable:$true] %s193_s8 }
   0xc   : > { %p492_p4 = pneg %p776_p3  ;;  %s716_s10 = smov 8  }
   0xd   : > { %s464_s11 = sadd.s32 4294967294, %s711_s21   ;;  %s790_s12 = sadd.s32 1, %s711_s21  }
   0xe   : > { %p493_p6 = pnand %p492_p4, %p43_p1  ;;  %s26_s13 = ssub.s32 %s711_s21, %s790_s12 }
   0xf   : > { %s29_s14 = sadd.s32 1, %s707_s20  ;;  %p27_p7 = scmp.eq.s32.totalorder %s26_s13, 0 }
  0x10   : > { %495 = dma.hbm_to_vmem [thread:$0]  (!%p493_p6), %s175_s24, 2048, %s177_s28, [#allocation6], %s715_s9, %s715_s9, %s716_s10  }
  0x11   : > { %498 = dma.hbm_to_vmem [thread:$0]  (!%p493_p6), %s192_s6, 2048, %s194_s8, [#allocation6], %s715_s9, %s715_s9, %s716_s10  }
  0x12   : > { %p36_p8 = scmp.ne.s32.totalorder %s707_s20, %s703_s19  ;;  %p37_p9 = scmp.eq.s32.totalorder %s711_s21, 0 }
  0x13   : > { %p42_p10 = scmp.ne.s32.totalorder %s703_s19, %s699_s18  ;;  %p150_p13 = scmp.eq.s32.totalorder %s771_s25, 1 }
  0x14   : > { %s801_s15 = scalar_select %p27_p7, %s707_s20, %s29_s14  }
  0x15   : > { %p803_p11 = por %p37_p9, %p36_p8  ;;  %p809_p12 = por %p43_p1, %p42_p10 }
  0x16   : > { %p156_p0 = scmp.eq.s32.totalorder %s464_s11, 1  ;;  %p509_p2 = scmp.lt.s32.totalorder %s711_s21, 2 }
  0x17   : > { %s210_s22 = sand.u32 1, %s707_s20   ;;  %p816_p4 = por %p150_p13, %p36_p8 }
  0x18   : > { %p820_p6 = por %p156_p0, %p42_p10  ;;  %s469_s27 = sshll.u32 %s210_s22, 3 }
  0x19   : > { %s470_s28 = sshll.u32 %s711_s21, 3  ;;  %s214_s7 = scalar_lea.vmem [#allocation2], %s469_s27 }
  0x1a   : > { %s218_s6 = scalar_lea.hbm %s905_s0, %s470_s28  ;;  %s222_s8 = sshll.u32 %s214_s7, 4  ;;  %s223_s8 = int_to_ptr.vmem [resolvable:$true] %s222_s8 }
  0x1b   : > { %s220_s9 = sshll.u32 %s218_s6, 4  ;;  %p830_p7 = pnand %p509_p2, %p803_p11  ;;  %s221_s9 = int_to_ptr.hbm [resolvable:$true] %s220_s9 }
  0x1c   : > { %s211_s11 = scalar_lea.sflag [#allocation3], %s210_s22  ;;  %s611_s13 = sshra.s32 %s221_s9, 4  ;;  %s612_s13 = int_to_ptr.hbm [resolvable:$true] %s611_s13 }
  0x1d   : > { %s613_s14 = scalar_lea.hbm %s612_s13, 8  ;;  %p615_p9 = pneg %p830_p7 }
  0x1e   : > { %p614_p8 = scmp.ne.s32.totalorder %s612_s13, %s613_s14  ;;  %s618_s29 = scalar_lea.hbm %s905_s0, 16 }
  0x1f   : > { %p619_p11 = scmp.lt.s32.totalorder %s612_s13, %s905_s0  ;;  %p620_p0 = scmp.lt.s32.totalorder %s618_s29, %s613_s14 }
  0x20   : > { %p616_p10 = pnand %p615_p9, %p614_p8 }
  0x21   : > { %p621_p2 = por %p620_p0, %p619_p11 }
  0x22   : > { %p617_p13 = pneg %p616_p10 }
  0x24   : > { %p622_p5 = pnand %p621_p2, %p617_p13 }
  0x26   : > { %625 = shalt.err (!%p622_p5)
}
  0x27   : > { %502 = dma.hbm_to_vmem [thread:$0]  (!%p830_p7), %s221_s9, 128, %s223_s8, %s211_s11  }
  0x28   : > { %231 = sbr.rel (%p776_p3) target bundleno = 343 (0x157), region = 40  ;;  %s847_s22 = sand.u32 (!%p776_p3), 1, %s703_s19  }
  0x29   : > { %s472_s6 = sshll.u32 (!%p776_p3), %s847_s22, 3  ;;  %s234_s7 = scalar_lea.sflag (!%p776_p3), [#allocation3], %s847_s22 }
  0x2a   : > { %s853_s13 = scalar_lea.vmem (!%p776_p3), [#allocation2], %s472_s6 }
  0x2d   : > { %686 = dma.done.wait (%p809_p12), %s234_s7, 128  }
  0x2e   : > { %688 = vsyncadd (%p809_p12), %s234_s7, 4294967168 }
  0x2f   : > { %690 = dma.done.wait (%p43_p1), [#allocation6], 4096  }
  0x30   : > { %692 = vsyncadd (%p43_p1), [#allocation6], 4294963200  ;;  %v291_v0 = vld [vmem:[#allocation5 + $0x78] sm:$0xff]  ;;  %v290_v1 = vld [vmem:[#allocation5 + $0x70] sm:$0xff]  ;;  %s477_s8 = sshll.u32 %s771_s25, 3  ;;  %s274_s28 = scalar_lea.vmem [#allocation8], %s472_s6 }
  0x31   : > { %296 = vmatpush.msra.mxu0 %v291_v0  ;;  %v289_v2 = vld [vmem:[#allocation5 + $0x68] sm:$0xff]  ;;  %v288_v3 = vld [vmem:[#allocation5 + $0x60] sm:$0xff]  ;;  %v332_v4 = vld [vmem:[#allocation7 + $0x78] sm:$0xff]  ;;  %s370_s27 = scalar_lea.hbm %s910_s5, %s477_s8  ;;  %s372_s29 = sshll.u32 %s274_s28, 4  ;;  %s373_s29 = int_to_ptr.vmem [resolvable:$true] %s372_s29 }
  0x32   : > { %v287_v5 = vld [vmem:[#allocation5 + $0x58] sm:$0xff]  ;;  %337 = vmatpush.msra.mxu1 %v332_v4  ;;  %v331_v6 = vld [vmem:[#allocation7 + $0x70] sm:$0xff]  ;;  %v330_v7 = vld [vmem:[#allocation7 + $0x68] sm:$0xff]  ;;  %s374_s30 = sshll.u32 %s370_s27, 4  ;;  %s360_s25 = scalar_lea.sflag [#allocation4], %s847_s22  ;;  %s375_s30 = int_to_ptr.hbm [resolvable:$true] %s374_s30 }
  0x33   : > { %297 = vmatpush.msra.mxu0 %v290_v1  ;;  %v286_v8 = vld [vmem:[#allocation5 + $0x50] sm:$0xff]  ;;  %v329_v9 = vld [vmem:[#allocation7 + $0x60] sm:$0xff]  ;;  %v285_v10 = vld [vmem:[#allocation5 + $0x48] sm:$0xff]  ;;  %s655_s16 = sshra.s32 %s375_s30, 4  ;;  %s661_s17 = scalar_lea.hbm %s910_s5, 16  ;;  %s656_s16 = int_to_ptr.hbm [resolvable:$true] %s655_s16 }
  0x34   : > { %338 = vmatpush.msra.mxu1 %v331_v6  ;;  %v328_v11 = vld [vmem:[#allocation7 + $0x58] sm:$0xff]  ;;  %v284_v12 = vld [vmem:[#allocation5 + $0x40] sm:$0xff]  ;;  %v327_v13 = vld [vmem:[#allocation7 + $0x50] sm:$0xff]  ;;  %s657_s7 = scalar_lea.hbm %s656_s16, 8  ;;  %p662_p12 = scmp.lt.s32.totalorder %s656_s16, %s910_s5 }
  0x35   : > { %298 = vmatpush.msra.mxu0 %v289_v2  ;;  %v283_v14 = vld [vmem:[#allocation5 + $0x38] sm:$0xff]  ;;  %v326_v15 = vld [vmem:[#allocation7 + $0x48] sm:$0xff]  ;;  %v282_v16 = vld [vmem:[#allocation5 + $0x30] sm:$0xff]  ;;  %p658_p1 = scmp.ne.s32.totalorder %s656_s16, %s657_s7  ;;  %p663_p7 = scmp.lt.s32.totalorder %s661_s17, %s657_s7 }
  0x36   : > { %339 = vmatpush.msra.mxu1 %v330_v7  ;;  %v325_v17 = vld [vmem:[#allocation7 + $0x40] sm:$0xff]  ;;  %v281_v18 = vld [vmem:[#allocation5 + $0x28] sm:$0xff]  ;;  %v324_v19 = vld [vmem:[#allocation7 + $0x38] sm:$0xff] }
  0x37   : > { %299 = vmatpush.msra.mxu0 %v288_v3  ;;  %v280_v20 = vld [vmem:[#allocation5 + $0x20] sm:$0xff]  ;;  %v323_v21 = vld [vmem:[#allocation7 + $0x30] sm:$0xff]  ;;  %v279_v22 = vld [vmem:[#allocation5 + $0x18] sm:$0xff]  ;;  %p659_p3 = pnand %p658_p1, %p816_p4  ;;  %p664_p8 = por %p663_p7, %p662_p12 }
  0x38   : > { %340 = vmatpush.msra.mxu1 %v329_v9  ;;  %v322_v23 = vld [vmem:[#allocation7 + $0x28] sm:$0xff]  ;;  %v278_v24 = vld [vmem:[#allocation5 + $0x10] sm:$0xff]  ;;  %v321_v25 = vld [vmem:[#allocation7 + $0x20] sm:$0xff] }
  0x39   : > { %300 = vmatpush.msra.mxu0 %v287_v5  ;;  %v277_v26 = vld [vmem:[#allocation5 + $0x8] sm:$0xff]  ;;  %v320_v27 = vld [vmem:[#allocation7 + $0x18] sm:$0xff]  ;;  %v276_v28 = vld [vmem:[#allocation5] sm:$0xff]  ;;  %p660_p5 = pneg %p659_p3 }
  0x3a   : > { %341 = vmatpush.msra.mxu1 %v328_v11  ;;  %v275_v29 = vld [vmem:[%s853_s13] sm:$0xff]  ;;  %v318_v31 = vld [vmem:[#allocation7 + $0x8] sm:$0xff]  ;;  %v317_v32 = vld [vmem:[#allocation7] sm:$0xff] }
  0x3b   : > { %301 = vmatpush.msra.mxu0 %v286_v8  ;;  %v319_v30 = vld [vmem:[#allocation7 + $0x10] sm:$0xff]  ;;  %p665_p9 = pnand %p664_p8, %p660_p5 }
  0x3c   : > { %342 = vmatpush.msra.mxu1 %v327_v13  ;;  %v549_v33 = vld [vmem:[%s907_s2] ss:$0 sm:$0xff] }
  0x3d   : > { %302 = vmatpush.msra.mxu0 %v285_v10  ;;  %v550_v37 = vld [vmem:[%s909_s4] ss:$0 sm:$0xff] }
  0x3e   : > { %343 = vmatpush.msra.mxu1 %v326_v15 }
  0x3f   : > { %303 = vmatpush.msra.mxu0 %v284_v12 }
  0x40   : > { %344 = vmatpush.msra.mxu1 %v325_v17 }
  0x41   : > { %304 = vmatpush.msra.mxu0 %v283_v14 }
  0x42   : > { %345 = vmatpush.msra.mxu1 %v324_v19 }
  0x43   : > { %305 = vmatpush.msra.mxu0 %v282_v16 }
  0x44   : > { %346 = vmatpush.msra.mxu1 %v323_v21 }
  0x45   : > { %306 = vmatpush.msra.mxu0 %v281_v18 }
  0x46   : > { %347 = vmatpush.msra.mxu1 %v322_v23 }
  0x47   : > { %307 = vmatpush.msra.mxu0 %v280_v20 }
  0x48   : > { %348 = vmatpush.msra.mxu1 %v321_v25 }
  0x49   : > { %308 = vmatpush.msra.mxu0 %v279_v22 }
  0x4a   : > { %349 = vmatpush.msra.mxu1 %v320_v27 }
  0x4b   : > { %309 = vmatpush.msra.mxu0 %v278_v24 }
  0x4c   : > { %350 = vmatpush.msra.mxu1 %v319_v30 }
  0x4d   : > { %310 = vmatpush.msra.mxu0 %v277_v26 }
  0x4e   : > { %351 = vmatpush.msra.mxu1 %v318_v31 }
  0x4f   : > { %311 = vmatpush.msra.mxu0 %v276_v28 }
  0x50   : > { %312 = vmatmul.f32.vlgmr.msra.gmra.mxu0 %v275_v29  ;;  %352 = vmatpush.msra.mxu1 %v317_v32 }
  0xcd   : > { %v313_v34 = vpop.f32.mrf.mxu0 }
  0xce   : > { %v314_v35 = vadd.f32 %v549_v33, %v313_v34 }
  0xd0   : > { %v316_v36 = vmax.f32 %v314_v35, 0.0 }
  0xd2   : > { %353 = vmatmul.f32.vlgmr.msra.gmra.mxu1 %v316_v36 }
 0x14f   : > { %v354_v38 = vpop.f32.mrf.mxu1 }
 0x150   : > { %v355_v39 = vadd.f32 %v550_v37, %v354_v38 }
 0x152   : > { %v357_v40 = vadd.f32 %v355_v39, %v275_v29 }
 0x154   : > { %358 = vst [vmem:[%s274_s28] sm:$0xff] %v357_v40 }
 0x155   : > { %668 = shalt.err (!%p665_p9)
}
 0x156   : > { %490 = dma.vmem_to_hbm [thread:$0]  (%p816_p4), %s373_s29, 128, %s375_s30, %s360_s25  }
 0x157 PF: > { %s386_s22 = sand.u32 1, %s699_s18   ;;  %p917_p10 = scmp.ge.s32.totalorder %s711_s21, 2 }
 0x158   : > { %s387_s9 = scalar_lea.sflag [#allocation4], %s386_s22 }
 0x159   : > { %p504_p13 = pnand %p917_p10, %p820_p6 }
 0x15b   : > { %p505_p11 = pneg %p504_p13 }
 0x15d   : > { %694 = dma.done.wait (%p505_p11), %s387_s9, 128  }
 0x15e   : > { %696 = vsyncadd (%p505_p11), %s387_s9, 4294967168  ;;  %p19_p0 = scmp.ge.s32.totalorder %s790_s12, 4   ;;  %s918_s18 = smov %s703_s19 }
 0x15f   : > { %s919_s19 = smov %s707_s20  ;;  %s920_s20 = smov %s801_s15 }
 0x160   : > { %s921_s21 = smov %s790_s12  ;;  %21 = sbr.rel (!%p19_p0) target bundleno = 6 (0x6), region = 93 }
 0x165   :  { %393 = vsyncpa [#allocation3], 1 }
 0x166   :  { %395 = vsyncpa [#allocation3 + $0x1], 1 }
 0x167   :  { %396 = vsyncpa [#allocation6], 1 }
 0x168   :  { %397 = vsyncpa [#allocation4], 1 }
 0x169   :  { %399 = vsyncpa [#allocation4 + $0x1], 1 }

</bundles_post_ra>
